<compile_context>
chip_gen: v5e
topology: v5e:2x2
jax: 0.10.0
libtpu: 0.0.40
codegen_flags: <defaults>
</compile_context>

<pallas_src>
import functools

import jax
import jax.numpy as jnp
from jax.experimental import pallas as pl
from jax.experimental.pallas import tpu as pltpu

IN_DIM, HID_DIM, OUT_DIM = 400, 100, 20   # logical (PyTorch) sizes
HID_PAD = 128                             # hidden padded to a full lane width
TB_MAX = 2048                             # max batch-tile rows (VMEM-safe on v5e/v6e/v7x)


def _round_up(n, m):
    return (n + m - 1) // m * m


def _choose_tb(B, tb_max=TB_MAX):
    """Batch-tile rows: multiple of 8, <= tb_max, and an even tile count when
    multi-tile so the 'parallel' grid axis balances across v7x's 2 TensorCores."""
    if B <= 16:
        return _round_up(max(B, 1), 8)                 # single small tile
    if B <= tb_max:
        return _round_up(pl.cdiv(B, 2), 8)             # two balanced tiles
    n_tiles = _round_up(pl.cdiv(B, tb_max), 2)         # even number of tiles
    return _round_up(pl.cdiv(B, n_tiles), 8)


def encoder_kernel(x_ref, w1_ref, b1_ref, w2_ref, b2_ref, o_ref, *, precision):
    w1 = w1_ref[...]                                   # (400, 128) resident in VMEM
    x = x_ref[...].astype(w1.dtype)                    # (TB, 400); no-op cast on f32 path
    h = jnp.dot(x, w1, preferred_element_type=jnp.float32, precision=precision)
    h = jnp.tanh(h + b1_ref[...])                      # f32 bias-add (VPU) + tanh (EUP)

    w2 = w2_ref[...]                                   # (128, 20) resident in VMEM
    y = jnp.dot(h.astype(w2.dtype), w2,
                preferred_element_type=jnp.float32, precision=precision)
    o_ref[...] = (y + b2_ref[...]).astype(o_ref.dtype)  # (TB, 20) store, no extra slice pass


def prepare_params(w1, b1, w2, b2, *, compute_dtype=jnp.float32):
    """One-time weight padding/layout. Weights stored in compute_dtype, biases in f32."""
    w1p = jnp.zeros((IN_DIM, HID_PAD), compute_dtype).at[:, :HID_DIM].set(
        jnp.asarray(w1, compute_dtype))
    b1p = jnp.zeros((1, HID_PAD), jnp.float32).at[:, :HID_DIM].set(
        jnp.asarray(b1, jnp.float32).reshape(1, HID_DIM))
    w2p = jnp.zeros((HID_PAD, OUT_DIM), compute_dtype).at[:HID_DIM, :].set(
        jnp.asarray(w2, compute_dtype))
    b2p = jnp.asarray(b2, jnp.float32).reshape(1, OUT_DIM)
    return w1p, b1p, w2p, b2p


def encoder_forward(x, padded_params, *, precision=jax.lax.Precision.HIGHEST):
    """x: (B, 400) -> (B, 20) f32, matching Linear(400,100) -> Tanh -> Linear(100,20).

    Exact-f32 PyTorch parity by default; pass params prepared with
    compute_dtype=jnp.bfloat16 (and/or bf16 x) for the fast MXU path.
    """
    w1p, b1p, w2p, b2p = padded_params
    B = x.shape[0]
    TB = _choose_tb(B)

    if w1p.dtype != jnp.float32:
        precision = None  # bf16 MXU path: single pass, f32 accumulation

    kernel = functools.partial(encoder_kernel, precision=precision)
    out = pl.pallas_call(
        kernel,
        out_shape=jax.ShapeDtypeStruct((B, OUT_DIM), jnp.float32),
        grid_spec=pltpu.PrefetchScalarGridSpec(
            num_scalar_prefetch=0,
            grid=(pl.cdiv(B, TB),),                               # ragged last block OK
            in_specs=[
                pl.BlockSpec((TB, IN_DIM), lambda i: (i, 0)),     # x: tiled, unpadded (400)
                pl.BlockSpec((IN_DIM, HID_PAD), lambda i: (0, 0)),  # w1: resident
                pl.BlockSpec((1, HID_PAD), lambda i: (0, 0)),       # b1: resident
                pl.BlockSpec((HID_PAD, OUT_DIM), lambda i: (0, 0)), # w2: resident
                pl.BlockSpec((1, OUT_DIM), lambda i: (0, 0)),       # b2: resident
            ],
            out_specs=pl.BlockSpec((TB, OUT_DIM), lambda i: (i, 0)),
        ),
        compiler_params=pltpu.CompilerParams(
            dimension_semantics=("parallel",),   # shard batch tiles across TCs (v7x)
            vmem_limit_bytes=32 << 20,           # explicit; footprint ~7 MiB at TB=2048
        ),
    )(x, w1p, b1p, w2p, b2p)
    return out


def init_params(key):
    # PyTorch nn.Linear default init: U(-1/sqrt(fan_in), +1/sqrt(fan_in)),
    # stored here as [in_features, out_features] so the kernel does x @ W + b.
    k1, k2, k3, k4 = jax.random.split(key, 4)
    lim1 = 1.0 / jnp.sqrt(IN_DIM)
    lim2 = 1.0 / jnp.sqrt(HID_DIM)
    w1 = jax.random.uniform(k1, (IN_DIM, HID_DIM), jnp.float32, -lim1, lim1)
    b1 = jax.random.uniform(k2, (1, HID_DIM), jnp.float32, -lim1, lim1)
    w2 = jax.random.uniform(k3, (HID_DIM, OUT_DIM), jnp.float32, -lim2, lim2)
    b2 = jax.random.uniform(k4, (1, OUT_DIM), jnp.float32, -lim2, lim2)
    return w1, b1, w2, b2


if __name__ == "__main__":
    key = jax.random.PRNGKey(0)
    kx, kx2, kp = jax.random.split(key, 3)
    w1, b1, w2, b2 = init_params(kp)
    params_f32 = prepare_params(w1, b1, w2, b2, compute_dtype=jnp.float32)
    params_bf16 = prepare_params(w1, b1, w2, b2, compute_dtype=jnp.bfloat16)

    # 1) Small batch, exact-f32 path (matches PyTorch Linear/Tanh/Linear semantics).
    B = 8
    x = jax.random.normal(kx, (B, IN_DIM), jnp.float32)
    out = encoder_forward(x, params_f32)
    jax.block_until_ready(out)
    ref = jnp.tanh(x @ w1 + b1) @ w2 + b2
    assert out.shape == (B, OUT_DIM)
    assert jnp.allclose(out, ref, atol=1e-5, rtol=1e-5)

    # 2) Ragged multi-tile batch (exercises the cdiv grid + partial last block),
    #    both the exact-f32 path and the bf16-weight fast path.
    B2 = 300  # not a multiple of the chosen tile
    x2 = jax.random.normal(kx2, (B2, IN_DIM), jnp.float32)
    ref2 = jnp.tanh(x2 @ w1 + b1) @ w2 + b2
    out_f32 = encoder_forward(x2, params_f32)
    out_bf16 = encoder_forward(x2, params_bf16)
    jax.block_until_ready((out_f32, out_bf16))
    assert out_f32.shape == (B2, OUT_DIM) and out_bf16.shape == (B2, OUT_DIM)
    assert jnp.allclose(out_f32, ref2, atol=1e-5, rtol=1e-5)
    assert jnp.allclose(out_bf16, ref2, atol=5e-2, rtol=5e-2)

    print("KERNEL_OK")
</pallas_src>

<mosaic_0001>
module attributes {stable_mosaic.version = 11 : i64} {
  func.func @encoder_kernel(%arg0: i32, %arg1: memref<8x400xf32, #tpu.memory_space<vmem>>, %arg2: memref<400x128xf32, #tpu.memory_space<vmem>>, %arg3: memref<1x128xf32, #tpu.memory_space<vmem>>, %arg4: memref<128x20xf32, #tpu.memory_space<vmem>>, %arg5: memref<1x20xf32, #tpu.memory_space<vmem>>, %arg6: memref<8x20xf32, #tpu.memory_space<vmem>>) attributes {dimension_semantics = [#tpu.dimension_semantics<parallel>], iteration_bounds = array<i64: 1>, scalar_prefetch = 0 : i64, scratch_operands = 0 : i64, tpu.core_type = #tpu.core_type<tc>, window_params = [{transform_indices = @transform_0, window_bounds = array<i64: 8, 400>}, {pipeline_mode = #tpu.pipeline_mode<synchronous>, transform_indices = @transform_1, window_bounds = array<i64: 400, 128>}, {pipeline_mode = #tpu.pipeline_mode<synchronous>, transform_indices = @transform_2, window_bounds = array<i64: 1, 128>}, {pipeline_mode = #tpu.pipeline_mode<synchronous>, transform_indices = @transform_3, window_bounds = array<i64: 128, 20>}, {pipeline_mode = #tpu.pipeline_mode<synchronous>, transform_indices = @transform_4, window_bounds = array<i64: 1, 20>}, {transform_indices = @transform_5, window_bounds = array<i64: 8, 20>}]} {
    %c0 = arith.constant 0 : index
    %c0_0 = arith.constant 0 : index
    %0 = vector.load %arg2[%c0, %c0_0] : memref<400x128xf32, #tpu.memory_space<vmem>>, vector<400x128xf32>
    %c0_1 = arith.constant 0 : index
    %c0_2 = arith.constant 0 : index
    %1 = vector.load %arg1[%c0_1, %c0_2] : memref<8x400xf32, #tpu.memory_space<vmem>>, vector<8x400xf32>
    %cst = arith.constant dense<0.000000e+00> : vector<8x128xf32>
    %2 = tpu.matmul %1, %0, %cst {dimension_numbers = #tpu.dot_dimension_numbers<[1], [0], [0], [1], [0, 0, 1, 1], [], []>, precision = #tpu.contract_precision<fp32>} : vector<8x400xf32>, vector<400x128xf32>, vector<8x128xf32> -> vector<8x128xf32>
    %c0_3 = arith.constant 0 : index
    %c0_4 = arith.constant 0 : index
    %3 = vector.load %arg3[%c0_3, %c0_4] : memref<1x128xf32, #tpu.memory_space<vmem>>, vector<1x128xf32>
    %4 = vector.broadcast %3 : vector<1x128xf32> to vector<8x128xf32>
    %5 = arith.addf %2, %4 : vector<8x128xf32>
    %6 = math.tanh %5 : vector<8x128xf32>
    %c0_5 = arith.constant 0 : index
    %c0_6 = arith.constant 0 : index
    %7 = vector.load %arg4[%c0_5, %c0_6] : memref<128x20xf32, #tpu.memory_space<vmem>>, vector<128x20xf32>
    %cst_7 = arith.constant dense<0.000000e+00> : vector<8x20xf32>
    %8 = tpu.matmul %6, %7, %cst_7 {dimension_numbers = #tpu.dot_dimension_numbers<[1], [0], [0], [1], [0, 0, 1, 1], [], []>, precision = #tpu.contract_precision<fp32>} : vector<8x128xf32>, vector<128x20xf32>, vector<8x20xf32> -> vector<8x20xf32>
    %c0_8 = arith.constant 0 : index
    %c0_9 = arith.constant 0 : index
    %9 = vector.load %arg5[%c0_8, %c0_9] : memref<1x20xf32, #tpu.memory_space<vmem>>, vector<1x20xf32>
    %10 = vector.broadcast %9 : vector<1x20xf32> to vector<8x20xf32>
    %11 = arith.addf %8, %10 : vector<8x20xf32>
    %c0_10 = arith.constant 0 : index
    %c0_11 = arith.constant 0 : index
    %12 = vector.load %arg6[%c0_10, %c0_11] : memref<8x20xf32, #tpu.memory_space<vmem>>, vector<8x20xf32>
    tpu.vector_store %arg6[%c0_10, %c0_11], %11 {strides = array<i32>} : memref<8x20xf32, #tpu.memory_space<vmem>>, vector<8x20xf32>,
    return
  }
  func.func @transform_0(%arg0: i32) -> (i32, i32) {
    %c0_i32 = arith.constant 0 : i32
    %c0_i32_0 = arith.constant 0 : i32
    return %arg0, %c0_i32 : i32, i32
  }
  func.func @transform_1(%arg0: i32) -> (i32, i32) {
    %c0_i32 = arith.constant 0 : i32
    %c0_i32_0 = arith.constant 0 : i32
    %c0_i32_1 = arith.constant 0 : i32
    return %c0_i32, %c0_i32_0 : i32, i32
  }
  func.func @transform_2(%arg0: i32) -> (i32, i32) {
    %c0_i32 = arith.constant 0 : i32
    %c0_i32_0 = arith.constant 0 : i32
    %c0_i32_1 = arith.constant 0 : i32
    return %c0_i32, %c0_i32_0 : i32, i32
  }
  func.func @transform_3(%arg0: i32) -> (i32, i32) {
    %c0_i32 = arith.constant 0 : i32
    %c0_i32_0 = arith.constant 0 : i32
    %c0_i32_1 = arith.constant 0 : i32
    return %c0_i32, %c0_i32_0 : i32, i32
  }
  func.func @transform_4(%arg0: i32) -> (i32, i32) {
    %c0_i32 = arith.constant 0 : i32
    %c0_i32_0 = arith.constant 0 : i32
    %c0_i32_1 = arith.constant 0 : i32
    return %c0_i32, %c0_i32_0 : i32, i32
  }
  func.func @transform_5(%arg0: i32) -> (i32, i32) {
    %c0_i32 = arith.constant 0 : i32
    %c0_i32_0 = arith.constant 0 : i32
    return %arg0, %c0_i32 : i32, i32
  }
}

</mosaic_0001>

<bundles_post_ra>
// kernel: tpu_custom_call.1
= control target key start
LH: loop header
LB: loop body
LE: loop exit
PB: predicated region body
PF: predicated region fallthrough
CT: control target
= control target key end

     0   :  { %10 = vsyncpa [#allocation3], 0  ;;  %s2833_s0 = inlined_call_operand.vmem [shape: f32[8,400], index: 0, kind: input, shape index: {}]   ;;  %s2834_s1 = inlined_call_operand.hbm [shape: f32[400,128], index: 1, kind: input, shape index: {}]   ;;  %s2835_s2 = inlined_call_operand.vmem [shape: f32[1,128], index: 2, kind: input, shape index: {}]   ;;  %s2836_s3 = inlined_call_operand.vmem [shape: f32[128,20], index: 3, kind: input, shape index: {}]   ;;  %s2837_s4 = inlined_call_operand.vmem [shape: f32[1,20], index: 4, kind: input, shape index: {}]   ;;  %s2838_s5 = inlined_call_operand.hbm [shape: f32[8,20], index: 5, kind: output, shape index: {}]  }
   0x1   :  { %11 = vsyncpa [#allocation4], 0  ;;  %s18_s20 = sshll.u32 %s2834_s1, 4  ;;  %s1722_s21 = smov [#allocation2]   ;;  %s19_s20 = int_to_ptr.hbm [resolvable:$true] %s18_s20 }
   0x2   :  { %s20_s22 = sshll.u32 %s1722_s21, 4  ;;  %s1723_s23 = smov 128   ;;  %s21_s22 = int_to_ptr.vmem [resolvable:$true] %s20_s22 }
   0x3   :  { %s1724_s24 = smov 8  }
   0x4   :  { %26 = dma.hbm_to_vmem [thread:$0]  %s19_s20, 6400, %s21_s22, [#allocation3], %s1723_s23, %s1723_s23, %s1724_s24  }
   0x5   :  { %1718 = dma.done.wait [#allocation3], 6400  }
   0x6   :  { %1719 = vsyncadd [#allocation3], 4294960896  ;;  %v52_v0 = vld [vmem:[#allocation2 + $0x78] sm:$0xff]  ;;  %v51_v1 = vld [vmem:[#allocation2 + $0x70] sm:$0xff]  ;;  %vm95_vm0 = vcmask 130048   ;;  %s1725_s13 = smov [#allocation5]  }
   0x7   :  { %v50_v2 = vld [vmem:[#allocation2 + $0x68] sm:$0xff]  ;;  %v1759_v3 = vand.u32 4294901760, %v52_v0  ;;  %v1761_v4 = vand.u32 4294901760, %v51_v1  ;;  %v49_v6 = vld [vmem:[#allocation2 + $0x60] sm:$0xff]  ;;  %v48_v7 = vld [vmem:[#allocation2 + $0x58] sm:$0xff]  ;;  %s1650_s14 = sshll.u32 %s1725_s13, 4  ;;  %s1651_s14 = int_to_ptr.vmem [resolvable:$true] %s1650_s14 }
   0x8   :  { %v1763_v5 = vand.u32 4294901760, %v50_v2  ;;  %v47_v8 = vld [vmem:[#allocation2 + $0x50] sm:$0xff]  ;;  %v1765_v9 = vand.u32 4294901760, %v49_v6  ;;  %v1767_v10 = vand.u32 4294901760, %v48_v7  ;;  %v46_v12 = vld [vmem:[#allocation2 + $0x48] sm:$0xff]  ;;  %v45_v13 = vld [vmem:[#allocation2 + $0x40] sm:$0xff] }
   0x9   :  { %v1769_v11 = vand.u32 4294901760, %v47_v8  ;;  %100 = vmatpush.msra.mxu0 %v1759_v3  ;;  %v1773_v14 = vsub.f32 %v52_v0, %v1759_v3  ;;  %v1776_v15 = vsub.f32 %v51_v1, %v1761_v4  ;;  %296 = vmatpush.msra.mxu3 %v1759_v3  ;;  %v1782_v17 = vand.u32 4294901760, %v46_v12  ;;  %v44_v21 = vld [vmem:[#allocation2 + $0x38] sm:$0xff]  ;;  %v43_v26 = vld [vmem:[#allocation2 + $0x30] sm:$0xff]  ;;  %v42_v36 = vld [vmem:[#allocation2 + $0x28] sm:$0xff]  ;;  %s1652_s17 = sshll.u32 %s2838_s5, 4  ;;  %s1653_s17 = int_to_ptr.hbm [resolvable:$true] %s1652_s17 }
   0xa   :  { %v1780_v16 = vsub.f32 %v50_v2, %v1763_v5  ;;  %v1785_v18 = vsub.f32 %v49_v6, %v1765_v9  ;;  %v1788_v19 = vsub.f32 %v48_v7, %v1767_v10  ;;  %v1798_v25 = vand.u32 4294901760, %v45_v13  ;;  %v41_v42 = vld [vmem:[#allocation2 + $0x20] sm:$0xff]  ;;  %v40_v47 = vld [vmem:[#allocation2 + $0x18] sm:$0xff]  ;;  %v39_v54 = vld [vmem:[#allocation2 + $0x10] sm:$0xff] }
   0xb   :  { %v1791_v20 = vsub.f32 %v47_v8, %v1769_v11  ;;  %102 = vmatpush.msra.mxu0 %v1761_v4  ;;  %243 = vmatpush.msra.mxu2 %v1773_v14  ;;  %v142_v22 = vand.u32 4294901760, %v1773_v14  ;;  %v2854_v23 = vand.u32 4294901760, %v1776_v15  ;;  %v1804_v29 = vsub.f32 %v46_v12, %v1782_v17  ;;  %v68_v59 = vld [vmem:[#allocation2 + $0xf8] sm:$0xff]  ;;  %v38_v61 = vld [vmem:[#allocation2 + $0x8] sm:$0xff]  ;;  %v37_v2 = vld [vmem:[#allocation2] sm:$0xff] }
   0xc   :  { %v2852_v24 = vand.u32 4294901760, %v1780_v16  ;;  %298 = vmatpush.msra.mxu3 %v1761_v4  ;;  %v2851_v27 = vand.u32 4294901760, %v1785_v18  ;;  %v2848_v28 = vand.u32 4294901760, %v1788_v19  ;;  %v1817_v33 = vand.u32 4294901760, %v44_v21  ;;  %v67_v6 = vld [vmem:[#allocation2 + $0xf0] sm:$0xff] }
   0xd   :  { %104 = vmatpush.msra.mxu0 %v1763_v5  ;;  %246 = vmatpush.msra.mxu2 %v1776_v15  ;;  %v143_v30 = vsub.f32 %v1773_v14, %v142_v22  ;;  %v149_v31 = vsub.f32 %v1776_v15, %v2854_v23  ;;  %v1820_v34 = vand.u32 4294901760, %v43_v26  ;;  %v2846_v35 = vand.u32 4294901760, %v1791_v20 }
   0xe   :  { %v155_v32 = vsub.f32 %v1780_v16, %v2852_v24  ;;  %300 = vmatpush.msra.mxu3 %v1763_v5  ;;  %v161_v39 = vsub.f32 %v1785_v18, %v2851_v27  ;;  %v1829_v40 = vsub.f32 %v45_v13, %v1798_v25  ;;  %v167_v41 = vsub.f32 %v1788_v19, %v2848_v28 }
   0xf   :  { %106 = vmatpush.msra.mxu0 %v1765_v9  ;;  %v144_v37 = vand.u32 4294901760, %v143_v30  ;;  %249 = vmatpush.msra.mxu2 %v1780_v16  ;;  %v150_v38 = vand.u32 4294901760, %v149_v31  ;;  %v1836_v44 = vand.u32 4294901760, %v42_v36  ;;  %v2845_v45 = vand.u32 4294901760, %v1804_v29 }
  0x10   :  { %302 = vmatpush.msra.mxu3 %v1765_v9  ;;  %v156_v43 = vand.u32 4294901760, %v155_v32  ;;  %v1840_v46 = vsub.f32 %v44_v21, %v1817_v33  ;;  %v173_v48 = vsub.f32 %v1791_v20, %v2846_v35  ;;  %v162_v49 = vand.u32 4294901760, %v161_v39  ;;  %v66_v32 = vld [vmem:[#allocation2 + $0xe8] sm:$0xff] }
  0x11   :  { %108 = vmatpush.msra.mxu0 %v1767_v10  ;;  %145 = vmatpush.msra.mxu1 %v144_v37  ;;  %v1848_v50 = vand.u32 4294901760, %v41_v42  ;;  %v2844_v51 = vand.u32 4294901760, %v1829_v40  ;;  %v1852_v52 = vsub.f32 %v43_v26, %v1820_v34  ;;  %v1856_v53 = vand.u32 4294901760, %v40_v47 }
  0x12   :  { %252 = vmatpush.msra.mxu2 %v1785_v18  ;;  %304 = vmatpush.msra.mxu3 %v1767_v10  ;;  %v168_v55 = vand.u32 4294901760, %v167_v41  ;;  %v179_v56 = vsub.f32 %v1804_v29, %v2845_v45  ;;  %v2843_v57 = vand.u32 4294901760, %v1840_v46  ;;  %v1864_v58 = vsub.f32 %v42_v36, %v1836_v44  ;;  %v61_v45 = vld [vmem:[#allocation2 + $0xc0] sm:$0xff] }
  0x13   :  { %110 = vmatpush.msra.mxu0 %v1769_v11  ;;  %151 = vmatpush.msra.mxu1 %v150_v38  ;;  %v174_v60 = vand.u32 4294901760, %v173_v48  ;;  %v185_v62 = vsub.f32 %v1829_v40, %v2844_v51  ;;  %v1872_v63 = vand.u32 4294901760, %v39_v54  ;;  %v2842_v0 = vand.u32 4294901760, %v1852_v52 }
  0x14   :  { %255 = vmatpush.msra.mxu2 %v1788_v19  ;;  %306 = vmatpush.msra.mxu3 %v1769_v11  ;;  %v1876_v1 = vsub.f32 %v41_v42, %v1848_v50  ;;  %v1881_v7 = vsub.f32 %v40_v47, %v1856_v53  ;;  %v1883_v8 = vand.u32 4294901760, %v68_v59  ;;  %v180_v12 = vand.u32 4294901760, %v179_v56 }
  0x15   :  { %112 = vmatpush.msra.mxu0 %v1782_v17  ;;  %157 = vmatpush.msra.mxu1 %v156_v43  ;;  %v191_v13 = vsub.f32 %v1840_v46, %v2843_v57  ;;  %v1889_v21 = vand.u32 4294901760, %v38_v61  ;;  %v2840_v26 = vand.u32 4294901760, %v1864_v58  ;;  %v1894_v30 = vand.u32 4294901760, %v37_v2  ;;  %v65_v43 = vld [vmem:[#allocation2 + $0xe0] sm:$0xff]  ;;  %v62_v57 = vld [vmem:[#allocation2 + $0xc8] sm:$0xff] }
  0x16   :  { %258 = vmatpush.msra.mxu2 %v1791_v20  ;;  %308 = vmatpush.msra.mxu3 %v1782_v17  ;;  %v1896_v31 = vand.u32 4294901760, %v67_v6  ;;  %v186_v36 = vand.u32 4294901760, %v185_v62  ;;  %v197_v37 = vsub.f32 %v1852_v52, %v2842_v0  ;;  %v2839_v38 = vand.u32 4294901760, %v1876_v1 }
  0x17   :  { %114 = vmatpush.msra.mxu0 %v1798_v25  ;;  %163 = vmatpush.msra.mxu1 %v162_v49  ;;  %2858 = vst [vmem:[#allocation8_spill] sm:$0xff] %v1894_v30  ;;  %v1904_v39 = vsub.f32 %v39_v54, %v1872_v63  ;;  %v2841_v41 = vand.u32 4294901760, %v1881_v7  ;;  %v1910_v42 = vsub.f32 %v68_v59, %v1883_v8  ;;  %v192_v47 = vand.u32 4294901760, %v191_v13  ;;  %v64_v59 = vld [vmem:[#allocation2 + $0xd8] sm:$0xff]  ;;  %v63_v13 = vld [vmem:[#allocation2 + $0xd0] sm:$0xff] }
  0x18   :  { %261 = vmatpush.msra.mxu2 %v1804_v29  ;;  %310 = vmatpush.msra.mxu3 %v1798_v25  ;;  %v203_v48 = vsub.f32 %v1864_v58, %v2840_v26  ;;  %v1917_v49 = vsub.f32 %v38_v61, %v1889_v21  ;;  %v1919_v54 = vand.u32 4294901760, %v66_v32  ;;  %v1927_v56 = vsub.f32 %v67_v6, %v1896_v31 }
  0x19   :  { %116 = vmatpush.msra.mxu0 %v1817_v33  ;;  %169 = vmatpush.msra.mxu1 %v168_v55  ;;  %v1924_v55 = vsub.f32 %v37_v2, %v1894_v30  ;;  %v209_v61 = vsub.f32 %v1876_v1, %v2839_v38  ;;  %v2847_v62 = vand.u32 4294901760, %v1904_v39  ;;  %v215_v2 = vsub.f32 %v1881_v7, %v2841_v41 }
  0x1a   :  { %264 = vmatpush.msra.mxu2 %v1829_v40  ;;  %312 = vmatpush.msra.mxu3 %v1817_v33  ;;  %v2849_v6 = vand.u32 4294901760, %v1910_v42  ;;  %v1945_v38 = vsub.f32 %v66_v32, %v1919_v54  ;;  %v1947_v26 = vand.u32 4294901760, %v64_v59  ;;  %v2853_v0 = vand.u32 4294901760, %v1927_v56 }
  0x1b   :  { %118 = vmatpush.msra.mxu0 %v1820_v34  ;;  %175 = vmatpush.msra.mxu1 %v174_v60  ;;  %v198_v60 = vand.u32 4294901760, %v197_v37  ;;  %v2850_v37 = vand.u32 4294901760, %v1917_v49  ;;  %v2855_v41 = vand.u32 4294901760, %v1924_v55  ;;  %v221_v32 = vsub.f32 %v1904_v39, %v2847_v62 }
  0x1c   :  { %267 = vmatpush.msra.mxu2 %v1840_v46  ;;  %314 = vmatpush.msra.mxu3 %v1820_v34  ;;  %v1960_v51 = vand.u32 4294901760, %v63_v13  ;;  %v216_v35 = vand.u32 4294901760, %v215_v2  ;;  %v1973_v62 = vsub.f32 %v64_v59, %v1947_v26  ;;  %v1975_v28 = vand.u32 4294901760, %v62_v57  ;;  %v60_v2 = vld [vmem:[#allocation2 + $0xb8] sm:$0xff] }
  0x1d   :  { %120 = vmatpush.msra.mxu0 %v1836_v44  ;;  %181 = vmatpush.msra.mxu1 %v180_v12  ;;  %v1934_v12 = vand.u32 4294901760, %v65_v43  ;;  %v233_v59 = vsub.f32 %v1924_v55, %v2855_v41  ;;  %v1995_v23 = vand.u32 4294901760, %v60_v2  ;;  %v2860_v14 = vand.u32 4294901760, %v1776_v15 }
  0x1e   :  { %270 = vmatpush.msra.mxu2 %v1852_v52  ;;  %316 = vmatpush.msra.mxu3 %v1836_v44  ;;  %v1990_v24 = vsub.f32 %v63_v13, %v1960_v51  ;;  %v2003_v27 = vsub.f32 %v62_v57, %v1975_v28  ;;  %v2862_v15 = vand.u32 4294901760, %v1780_v16  ;;  %v2864_v16 = vand.u32 4294901760, %v1785_v18 }
  0x1f   :  { %122 = vmatpush.msra.mxu0 %v1848_v50  ;;  %187 = vmatpush.msra.mxu1 %v186_v36  ;;  %v204_v36 = vand.u32 4294901760, %v203_v48  ;;  %v1958_v48 = vsub.f32 %v65_v43, %v1934_v12  ;;  %v227_v43 = vsub.f32 %v1917_v49, %v2850_v37  ;;  %v222_v37 = vand.u32 4294901760, %v221_v32 }
  0x20   :  { %273 = vmatpush.msra.mxu2 %v1864_v58  ;;  %318 = vmatpush.msra.mxu3 %v1848_v50  ;;  %v2859_v32 = vand.u32 4294901760, %v1945_v38  ;;  %v2866_v18 = vand.u32 4294901760, %v1788_v19  ;;  %vm1643_vm1 = vcmask 162816  }
  0x21   :  { %124 = vmatpush.msra.mxu0 %v1856_v53  ;;  %193 = vmatpush.msra.mxu1 %v192_v47  ;;  %v210_v47 = vand.u32 4294901760, %v209_v61  ;;  %v59_v61 = vld [vmem:[#allocation2 + $0xb0] sm:$0xff] }
  0x22   :  { %276 = vmatpush.msra.mxu2 %v1876_v1  ;;  %320 = vmatpush.msra.mxu3 %v1856_v53  ;;  %v496_v41 = vsub.f32 %v1945_v38, %v2859_v32  ;;  %v2861_v32 = vand.u32 4294901760, %v1958_v48 }
  0x23   :  { %126 = vmatpush.msra.mxu0 %v1872_v63  ;;  %199 = vmatpush.msra.mxu1 %v198_v60  ;;  %v484_v60 = vsub.f32 %v1910_v42, %v2849_v6  ;;  %v1982_v6 = vand.u32 4294901760, %v61_v45 }
  0x24   :  { %279 = vmatpush.msra.mxu2 %v1881_v7  ;;  %322 = vmatpush.msra.mxu3 %v1872_v63  ;;  %v502_v13 = vsub.f32 %v1958_v48, %v2861_v32 }
  0x25   :  { %128 = vmatpush.msra.mxu0 %v1889_v21  ;;  %205 = vmatpush.msra.mxu1 %v204_v36  ;;  %v490_v36 = vsub.f32 %v1927_v56, %v2853_v0  ;;  %v485_v0 = vand.u32 4294901760, %v484_v60  ;;  %v58_v60 = vld [vmem:[#allocation2 + $0xa8] sm:$0xff] }
  0x26   :  { %282 = vmatpush.msra.mxu2 %v1904_v39  ;;  %324 = vmatpush.msra.mxu3 %v1889_v21  ;;  %v2028_v57 = vand.u32 4294901760, %v58_v60 }
  0x27   :  { %130 = vmatpush.msra.mxu0 %v1894_v30  ;;  %211 = vmatpush.msra.mxu1 %v210_v47  ;;  %v228_v47 = vand.u32 4294901760, %v227_v43  ;;  %v234_v43 = vand.u32 4294901760, %v233_v59  ;;  %v2863_v59 = vand.u32 4294901760, %v1973_v62 }
  0x28   :  { %285 = vmatpush.msra.mxu2 %v1917_v49  ;;  %326 = vmatpush.msra.mxu3 %v1894_v30  ;;  %v2016_v30 = vand.u32 4294901760, %v59_v61 }
  0x29   :  { %337 = vmatpush.msrb.mxu0 %v142_v22  ;;  %217 = vmatpush.msra.mxu1 %v216_v35  ;;  %v491_v22 = vand.u32 4294901760, %v490_v36  ;;  %v2009_v35 = vsub.f32 %v61_v45, %v1982_v6  ;;  %v2021_v45 = vsub.f32 %v60_v2, %v1995_v23  ;;  %v57_v36 = vld [vmem:[#allocation2 + $0xa0] sm:$0xff]  ;;  %v56_v2 = vld [vmem:[#allocation2 + $0x98] sm:$0xff] }
  0x2a   :  { %288 = vmatpush.msra.mxu2 %v1924_v55  ;;  %486 = vmatpush.msrb.mxu3 %v485_v0  ;;  %v2040_v32 = vand.u32 4294901760, %v57_v36  ;;  %v2056_v19 = vand.u32 4294901760, %v56_v2 }
  0x2b   :  { %341 = vmatpush.msrb.mxu0 %v2860_v14  ;;  %223 = vmatpush.msra.mxu1 %v222_v37  ;;  %v497_v37 = vand.u32 4294901760, %v496_v41  ;;  %v508_v14 = vsub.f32 %v1973_v62, %v2863_v59  ;;  %v2857_v0 = vand.u32 4294901760, %v2009_v35  ;;  %v2865_v41 = vand.u32 4294901760, %v1990_v24 }
  0x2c   :  { %441 = vmatpush.msrb.mxu2 %v1883_v8  ;;  %492 = vmatpush.msrb.mxu3 %v491_v22  ;;  %v2038_v59 = vsub.f32 %v59_v61, %v2016_v30  ;;  %v2867_v61 = vand.u32 4294901760, %v2003_v27 }
  0x2d   :  { %345 = vmatpush.msrb.mxu0 %v2862_v15  ;;  %229 = vmatpush.msra.mxu1 %v228_v47  ;;  %v503_v47 = vand.u32 4294901760, %v502_v13  ;;  %v514_v15 = vsub.f32 %v1990_v24, %v2865_v41  ;;  %v87_v13 = vld [vmem:[%s2833_s0] sm:$0xff]  ;;  %v2054_v41 = vsub.f32 %v58_v60, %v2028_v57  ;;  %v2067_v60 = vsub.f32 %v57_v36, %v2040_v32 }
  0x2e   :  { %443 = vmatpush.msrb.mxu2 %v1896_v31  ;;  %498 = vmatpush.msrb.mxu3 %v497_v37  ;;  %v55_v37 = vld [vmem:[#allocation2 + $0x90] sm:$0xff]  ;;  %v2069_v22 = vand.u32 4294901760, %v87_v13 }
  0x2f   :  { %349 = vmatpush.msrb.mxu0 %v2864_v16  ;;  %235 = vmatpush.msra.mxu1 %v234_v43  ;;  %v509_v43 = vand.u32 4294901760, %v508_v14  ;;  %v520_v16 = vsub.f32 %v2003_v27, %v2867_v61  ;;  %v515_v14 = vand.u32 4294901760, %v514_v15  ;;  %v2079_v36 = vand.u32 4294901760, %v55_v37 }
  0x30   :  { %445 = vmatpush.msrb.mxu2 %v1919_v54  ;;  %504 = vmatpush.msrb.mxu3 %v503_v47  ;;  %v2082_v61 = vsub.f32 %v56_v2, %v2056_v19  ;;  %v2093_v15 = vsub.f32 %v87_v13, %v2069_v22 }
  0x31   :  { %353 = vmatpush.msrb.mxu0 %v2866_v18  ;;  %404 = vmatpush.msrb.mxu1 %v1759_v3  ;;  %v2868_v3 = vand.u32 4294901760, %v1791_v20  ;;  %v526_v18 = vsub.f32 %v2009_v35, %v2857_v0  ;;  %v2869_v20 = vand.u32 4294901760, %v1804_v29  ;;  %v54_v0 = vld [vmem:[#allocation2 + $0x88] sm:$0xff]  ;;  %v521_v47 = vand.u32 4294901760, %v520_v16 }
  0x32   :  { %447 = vmatpush.msrb.mxu2 %v1934_v12  ;;  %510 = vmatpush.msrb.mxu3 %v509_v43  ;;  %v2871_v29 = vand.u32 4294901760, %v1829_v40  ;;  %v2872_v43 = vand.u32 4294901760, %v2038_v59  ;;  %v2095_v2 = vand.u32 4294901760, %v54_v0  ;;  %v2873_v40 = vand.u32 4294901760, %v1840_v46 }
  0x33   :  { %357 = vmatpush.msrb.mxu0 %v2868_v3  ;;  %406 = vmatpush.msrb.mxu1 %v1761_v4  ;;  %v2870_v4 = vand.u32 4294901760, %v2021_v45  ;;  %v2106_v13 = vsub.f32 %v55_v37, %v2079_v36  ;;  %v2875_v46 = vand.u32 4294901760, %v1852_v52 }
  0x34   :  { %449 = vmatpush.msrb.mxu2 %v1947_v26  ;;  %516 = vmatpush.msrb.mxu3 %v515_v14  ;;  %v538_v16 = vsub.f32 %v2038_v59, %v2872_v43  ;;  %v2119_v37 = vsub.f32 %v54_v0, %v2095_v2  ;;  %v2877_v0 = vand.u32 4294901760, %v1876_v1 }
  0x35   :  { %361 = vmatpush.msrb.mxu0 %v2869_v20  ;;  %408 = vmatpush.msrb.mxu1 %v1763_v5  ;;  %v532_v3 = vsub.f32 %v2021_v45, %v2870_v4  ;;  %v527_v5 = vand.u32 4294901760, %v526_v18  ;;  %v53_v20 = vld [vmem:[#allocation2 + $0x80] sm:$0xff]  ;;  %v549_v4 = vand.u32 4294901760, %v2067_v60  ;;  %v2874_v18 = vand.u32 4294901760, %v2054_v41 }
  0x36   :  { %451 = vmatpush.msrb.mxu2 %v1960_v51  ;;  %522 = vmatpush.msrb.mxu3 %v521_v47  ;;  %v2108_v43 = vand.u32 4294901760, %v53_v20  ;;  %v133_v47 = vand.u32 4294901760, %v2093_v15 }
  0x37   :  { %365 = vmatpush.msrb.mxu0 %v2871_v29  ;;  %410 = vmatpush.msrb.mxu1 %v1765_v9  ;;  %v533_v9 = vand.u32 4294901760, %v532_v3  ;;  %v544_v14 = vsub.f32 %v2054_v41, %v2874_v18  ;;  %v555_v29 = vand.u32 4294901760, %v2082_v61  ;;  %v550_v3 = vsub.f32 %v2067_v60, %v549_v4 }
  0x38   :  { %453 = vmatpush.msrb.mxu2 %v1975_v28  ;;  %528 = vmatpush.msrb.mxu3 %v527_v5  ;;  %v561_v5 = vand.u32 4294901760, %v2106_v13  ;;  %v567_v18 = vand.u32 4294901760, %v2119_v37 }
  0x39   :  { %369 = vmatpush.msrb.mxu0 %v2873_v40  ;;  %412 = vmatpush.msrb.mxu1 %v1767_v10  ;;  %v539_v10 = vand.u32 4294901760, %v538_v16  ;;  %v2876_v40 = vand.u32 4294901760, %v1864_v58  ;;  %v556_v52 = vsub.f32 %v2082_v61, %v555_v29  ;;  %v2130_v16 = vsub.f32 %v53_v20, %v2108_v43 }
  0x3a   :  { %455 = vmatpush.msrb.mxu2 %v1982_v6  ;;  %534 = vmatpush.msrb.mxu3 %v533_v9  ;;  %v551_v58 = vand.u32 4294901760, %v550_v3  ;;  %v134_v9 = vsub.f32 %v2093_v15, %v133_v47  ;;  %v2878_v20 = vand.u32 4294901760, %v1881_v7  ;;  %v562_v1 = vsub.f32 %v2106_v13, %v561_v5 }
  0x3b   :  { %373 = vmatpush.msrb.mxu0 %v2875_v46  ;;  %414 = vmatpush.msrb.mxu1 %v1769_v11  ;;  %v545_v11 = vand.u32 4294901760, %v544_v14  ;;  %v573_v14 = vand.u32 4294901760, %v2130_v16  ;;  %v568_v7 = vsub.f32 %v2119_v37, %v567_v18  ;;  %v2880_v3 = vand.u32 4294901760, %v1917_v49 }
  0x3c   :  { %457 = vmatpush.msrb.mxu2 %v1995_v23  ;;  %540 = vmatpush.msrb.mxu3 %v539_v10  ;;  %v2879_v10 = vand.u32 4294901760, %v1904_v39  ;;  %v563_v39 = vand.u32 4294901760, %v562_v1 }
  0x3d   :  { %377 = vmatpush.msrb.mxu0 %v2876_v40  ;;  %416 = vmatpush.msrb.mxu1 %v1782_v17  ;;  %v88_v17 = vld [vmem:[%s2833_s0 + $0x8] sm:$0xff] }
  0x3e   :  { %459 = vmatpush.msrb.mxu2 %v2016_v30  ;;  %546 = vmatpush.msrb.mxu3 %v545_v11  ;;  %v2149_v46 = vand.u32 4294901760, %v88_v17  ;;  %v2881_v11 = vand.u32 4294901760, %v1924_v55  ;;  %v2884_v55 = vld [vmem:[#allocation8_spill] sm:$0xff] }
  0x3f   :  { %381 = vmatpush.msrb.mxu0 %v2877_v0  ;;  %418 = vmatpush.msrb.mxu1 %v1798_v25  ;;  %v557_v25 = vand.u32 4294901760, %v556_v52 }
  0x40   :  { %461 = vmatpush.msrb.mxu2 %v2028_v57  ;;  %552 = vmatpush.msrb.mxu3 %v551_v58  ;;  %v2166_v40 = vsub.f32 %v88_v17, %v2149_v46 }
  0x41   :  { %385 = vmatpush.msrb.mxu0 %v2878_v20  ;;  %420 = vmatpush.msrb.mxu1 %v1817_v33  ;;  %v135_v33 = vand.u32 4294901760, %v134_v9  ;;  %v75_v9 = vld [vmem:[#allocation2 + $0x130] sm:$0xff] }
  0x42   :  { %463 = vmatpush.msrb.mxu2 %v2040_v32  ;;  %558 = vmatpush.msrb.mxu3 %v557_v25  ;;  %v474_v52 = vand.u32 4294901760, %v2166_v40 }
  0x43   :  { %389 = vmatpush.msrb.mxu0 %v2879_v10  ;;  %422 = vmatpush.msrb.mxu1 %v1820_v34  ;;  %v574_v34 = vsub.f32 %v2130_v16, %v573_v14 }
  0x44   :  { %465 = vmatpush.msrb.mxu2 %v2056_v19  ;;  %136 = vmatmul.f32.vlgmr.msra.gmra.mxu0 %v135_v33  ;;  %v2334_v33 = vand.u32 4294901760, %v75_v9 }
  0x45   :  { %393 = vmatpush.msrb.mxu0 %v2880_v3  ;;  %424 = vmatpush.msrb.mxu1 %v1836_v44  ;;  %v569_v44 = vand.u32 4294901760, %v568_v7  ;;  %v575_v49 = vand.u32 4294901760, %v574_v34 }
  0x46   :  { %467 = vmatpush.msrb.mxu2 %v2079_v36  ;;  %564 = vmatpush.msrb.mxu3 %v563_v39 }
  0x47   :  { %397 = vmatpush.msrb.mxu0 %v2881_v11  ;;  %426 = vmatpush.msrb.mxu1 %v1848_v50  ;;  %v2882_v50 = vand.u32 4294901760, %v1910_v42 }
  0x48   :  { %469 = vmatpush.msrb.mxu2 %v2095_v2  ;;  %570 = vmatpush.msrb.mxu3 %v569_v44 }
  0x49   :  { %584 = vmatpush.msra.mxu0 %v1910_v42  ;;  %428 = vmatpush.msrb.mxu1 %v1856_v53  ;;  %v475_v53 = vsub.f32 %v2166_v40, %v474_v52 }
  0x4a   :  { %471 = vmatpush.msrb.mxu2 %v2108_v43  ;;  %576 = vmatpush.msrb.mxu3 %v575_v49 }
  0x4b   :  { %587 = vmatpush.msra.mxu0 %v1927_v56  ;;  %430 = vmatpush.msrb.mxu1 %v1872_v63  ;;  %v2883_v63 = vand.u32 4294901760, %v1927_v56  ;;  %v476_v42 = vand.u32 4294901760, %v475_v53  ;;  %v2886_v56 = vand.u32 4294901760, %v1958_v48 }
  0x4c   :  { %291 = vmatmul.f32.vlgmr.msra.gmra.mxu2 %v2093_v15  ;;  %330 = vmatmul.f32.vlgmr.msra.gmra.mxu3 %v133_v47 }
  0x4d   :  { %590 = vmatpush.msra.mxu0 %v1945_v38  ;;  %678 = vmatpush.msra.mxu2 %v2882_v50 }
  0x4e   :  { %432 = vmatpush.msrb.mxu1 %v1889_v21  ;;  %745 = vmatpush.msra.mxu3 %v1883_v8  ;;  %v2885_v21 = vand.u32 4294901760, %v1945_v38  ;;  %v2887_v38 = vand.u32 4294901760, %v1973_v62 }
  0x4f   :  { %593 = vmatpush.msra.mxu0 %v1958_v48  ;;  %682 = vmatpush.msra.mxu2 %v2883_v63 }
  0x50   :  { %434 = vmatpush.msrb.mxu1 %v2884_v55  ;;  %747 = vmatpush.msra.mxu3 %v1896_v31  ;;  %v2365_v55 = vsub.f32 %v75_v9, %v2334_v33 }
  0x51   :  { %596 = vmatpush.msra.mxu0 %v1973_v62  ;;  %237 = vmatmul.f32.vlgmr.msra.gmra.mxu1 %v2069_v22 }
  0x52   :  { %686 = vmatpush.msra.mxu2 %v2885_v21  ;;  %637 = vmatpush.msra.mxu1 %v1883_v8  ;;  %v2888_v8 = vand.u32 4294901760, %v1990_v24 }
  0x53   :  { %599 = vmatpush.msra.mxu0 %v1990_v24  ;;  %749 = vmatpush.msra.mxu3 %v1919_v54  ;;  %v2890_v24 = vand.u32 4294901760, %v2009_v35 }
  0x54   :  { %690 = vmatpush.msra.mxu2 %v2886_v56  ;;  %639 = vmatpush.msra.mxu1 %v1896_v31  ;;  %v2889_v31 = vand.u32 4294901760, %v2003_v27 }
  0x55   :  { %477 = vmatmul.f32.vlgmr.msrb.gmra.mxu2 %v476_v42  ;;  %602 = vmatpush.msra.mxu0 %v2003_v27  ;;  %v83_v27 = vld [vmem:[#allocation2 + $0x170] sm:$0xff] }
  0x56   :  { %641 = vmatpush.msra.mxu1 %v1919_v54  ;;  %694 = vmatpush.msra.mxu2 %v2887_v38  ;;  %v84_v54 = vld [vmem:[#allocation2 + $0x178] sm:$0xff]  ;;  %v2242_v48 = vand.u32 4294901760, %v83_v27  ;;  %v71_v42 = vld [vmem:[#allocation2 + $0x110] sm:$0xff] }
  0x57   :  { %751 = vmatpush.msra.mxu3 %v1934_v12  ;;  %399 = vmatmul.f32.vlgmr.msrb.gmra.mxu0 %v2069_v22  ;;  %v2235_v62 = vand.u32 4294901760, %v84_v54 }
  0x58   :  { %578 = vmatmul.f32.vlgmr.msrb.gmra.mxu3 %v2149_v46  ;;  %605 = vmatpush.msra.mxu0 %v2009_v35 }
  0x59   :  { %643 = vmatpush.msra.mxu1 %v1934_v12  ;;  %698 = vmatpush.msra.mxu2 %v2888_v8  ;;  %v2893_v12 = vand.u32 4294901760, %v2054_v41 }
  0x5a   :  { %753 = vmatpush.msra.mxu3 %v1947_v26  ;;  %436 = vmatmul.f32.vlgmr.msrb.gmra.mxu1 %v2069_v22  ;;  %v79_v22 = vld [vmem:[#allocation2 + $0x150] sm:$0xff] }
  0x5b   :  { %608 = vmatpush.msra.mxu0 %v2021_v45  ;;  %645 = vmatpush.msra.mxu1 %v1947_v26  ;;  %v2891_v26 = vand.u32 4294901760, %v2021_v45  ;;  %v80_v45 = vld [vmem:[#allocation2 + $0x158] sm:$0xff]  ;;  %v2277_v15 = vand.u32 4294901760, %v79_v22 }
  0x5c   :  { %702 = vmatpush.msra.mxu2 %v2889_v31  ;;  %755 = vmatpush.msra.mxu3 %v1960_v51 }
  0x5d   :  { %611 = vmatpush.msra.mxu0 %v2038_v59  ;;  %647 = vmatpush.msra.mxu1 %v1960_v51  ;;  %v2892_v51 = vand.u32 4294901760, %v2038_v59  ;;  %v2262_v59 = vsub.f32 %v83_v27, %v2242_v48 }
  0x5e   :  { %706 = vmatpush.msra.mxu2 %v2890_v24  ;;  %757 = vmatpush.msra.mxu3 %v1975_v28 }
  0x5f   :  { %614 = vmatpush.msra.mxu0 %v2054_v41  ;;  %649 = vmatpush.msra.mxu1 %v1975_v28  ;;  %v82_v28 = vld [vmem:[#allocation2 + $0x168] sm:$0xff] }
  0x60   :  { %710 = vmatpush.msra.mxu2 %v2891_v26  ;;  %759 = vmatpush.msra.mxu3 %v1982_v6  ;;  %v2249_v35 = vand.u32 4294901760, %v82_v28  ;;  %v70_v26 = vld [vmem:[#allocation2 + $0x108] sm:$0xff] }
  0x61   :  { %617 = vmatpush.msra.mxu0 %v2067_v60  ;;  %651 = vmatpush.msra.mxu1 %v1982_v6  ;;  %v81_v6 = vld [vmem:[#allocation2 + $0x160] sm:$0xff]  ;;  %v78_v60 = vld [vmem:[#allocation2 + $0x148] sm:$0xff] }
  0x62   :  { %714 = vmatpush.msra.mxu2 %v2892_v51  ;;  %761 = vmatpush.msra.mxu3 %v1995_v23  ;;  %v2387_v51 = vand.u32 4294901760, %v71_v42 }
  0x63   :  { %620 = vmatpush.msra.mxu0 %v2082_v61  ;;  %653 = vmatpush.msra.mxu1 %v1995_v23  ;;  %v2252_v23 = vsub.f32 %v84_v54, %v2235_v62  ;;  %v2273_v61 = vsub.f32 %v82_v28, %v2249_v35  ;;  %v878_v28 = vand.u32 4294901760, %v2365_v55 }
  0x64   :  { %718 = vmatpush.msra.mxu2 %v2893_v12  ;;  %763 = vmatpush.msra.mxu3 %v2016_v30 }
  0x65   :  { %623 = vmatpush.msra.mxu0 %v2106_v13  ;;  %655 = vmatpush.msra.mxu1 %v2016_v30  ;;  %v2259_v30 = vand.u32 4294901760, %v81_v6  ;;  %v824_v41 = vand.u32 4294901760, %v2252_v23  ;;  %v77_v13 = vld [vmem:[#allocation2 + $0x140] sm:$0xff]  ;;  %v836_v47 = vand.u32 4294901760, %v2273_v61  ;;  %v879_v9 = vsub.f32 %v2365_v55, %v878_v28 }
  0x66   :  { %722 = vmatpush.msra.mxu2 %v549_v4  ;;  %765 = vmatpush.msra.mxu3 %v2028_v57  ;;  %v2310_v0 = vand.u32 4294901760, %v77_v13 }
  0x67   :  { %626 = vmatpush.msra.mxu0 %v2119_v37  ;;  %657 = vmatpush.msra.mxu1 %v2028_v57  ;;  %v2269_v57 = vand.u32 4294901760, %v80_v45  ;;  %v2284_v4 = vsub.f32 %v81_v6, %v2259_v30  ;;  %v837_v20 = vsub.f32 %v2273_v61, %v836_v47 }
  0x68   :  { %726 = vmatpush.msra.mxu2 %v555_v29  ;;  %767 = vmatpush.msra.mxu3 %v2040_v32  ;;  %v2288_v29 = vand.u32 4294901760, %v78_v60  ;;  %v2337_v7 = vsub.f32 %v77_v13, %v2310_v0 }
  0x69   :  { %629 = vmatpush.msra.mxu0 %v2130_v16  ;;  %659 = vmatpush.msra.mxu1 %v2040_v32  ;;  %v830_v32 = vand.u32 4294901760, %v2262_v59  ;;  %v2298_v37 = vsub.f32 %v80_v45, %v2269_v57  ;;  %v842_v17 = vand.u32 4294901760, %v2284_v4  ;;  %v838_v39 = vand.u32 4294901760, %v837_v20 }
  0x6a   :  { %730 = vmatpush.msra.mxu2 %v561_v5  ;;  %769 = vmatpush.msra.mxu3 %v2056_v19  ;;  %v76_v5 = vld [vmem:[#allocation2 + $0x138] sm:$0xff]  ;;  %v2316_v58 = vsub.f32 %v78_v60, %v2288_v29  ;;  %v866_v63 = vand.u32 4294901760, %v2337_v7  ;;  %v2402_v60 = vand.u32 4294901760, %v70_v26  ;;  %v2416_v20 = vsub.f32 %v71_v42, %v2387_v51 }
  0x6b   :  { %632 = vmatmul.f32.vlgmr.msra.gmra.mxu0 %v2166_v40  ;;  %661 = vmatpush.msra.mxu1 %v2056_v19  ;;  %v825_v19 = vsub.f32 %v2252_v23, %v824_v41  ;;  %v831_v16 = vsub.f32 %v2262_v59, %v830_v32  ;;  %v2323_v25 = vand.u32 4294901760, %v76_v5  ;;  %v848_v1 = vand.u32 4294901760, %v2298_v37  ;;  %v89_v40 = vld [vmem:[%s2833_s0 + $0x10] sm:$0xff] }
  0x6c   :  { %782 = vmatpush.msrb.mxu0 %v2235_v62  ;;  %734 = vmatpush.msra.mxu2 %v567_v18  ;;  %v843_v10 = vsub.f32 %v2284_v4, %v842_v17  ;;  %v860_v3 = vand.u32 4294901760, %v2316_v58  ;;  %v2372_v56 = vand.u32 4294901760, %v89_v40  ;;  %v867_v27 = vsub.f32 %v2337_v7, %v866_v63 }
  0x6d   :  { %771 = vmatpush.msra.mxu3 %v2079_v36  ;;  %663 = vmatpush.msra.mxu1 %v2079_v36  ;;  %v2303_v36 = vsub.f32 %v79_v22, %v2277_v15  ;;  %v826_v18 = vand.u32 4294901760, %v825_v19  ;;  %v849_v34 = vsub.f32 %v2298_v37, %v848_v1  ;;  %v2350_v44 = vsub.f32 %v76_v5, %v2323_v25  ;;  %v69_v5 = vld [vmem:[#allocation2 + $0x100] sm:$0xff] }
  0x6e   :  { %784 = vmatpush.msrb.mxu0 %v2242_v48  ;;  %738 = vmatpush.msra.mxu2 %v573_v14  ;;  %v74_v14 = vld [vmem:[#allocation2 + $0x128] sm:$0xff]  ;;  %v844_v50 = vand.u32 4294901760, %v843_v10  ;;  %v861_v21 = vsub.f32 %v2316_v58, %v860_v3  ;;  %v2396_v45 = vsub.f32 %v89_v40, %v2372_v56  ;;  %v880_v40 = vand.u32 4294901760, %v879_v9 }
  0x6f   :  { %773 = vmatpush.msra.mxu3 %v2095_v2  ;;  %740 = vmatmul.f32.vlgmr.msra.gmra.mxu2 %v2149_v46  ;;  %v2347_v11 = vand.u32 4294901760, %v74_v14  ;;  %v850_v38 = vand.u32 4294901760, %v849_v34  ;;  %v872_v31 = vand.u32 4294901760, %v2350_v44  ;;  %v2429_v34 = vsub.f32 %v70_v26, %v2402_v60 }
  0x70   :  { %786 = vmatpush.msrb.mxu0 %v2249_v35  ;;  %925 = vmatpush.msrb.mxu2 %v2252_v23  ;;  %v862_v6 = vand.u32 4294901760, %v861_v21 }
  0x71   :  { %665 = vmatpush.msra.mxu1 %v2095_v2  ;;  %775 = vmatpush.msra.mxu3 %v2108_v43  ;;  %v854_v2 = vand.u32 4294901760, %v2303_v36  ;;  %v2379_v24 = vsub.f32 %v74_v14, %v2347_v11  ;;  %v873_v22 = vsub.f32 %v2350_v44, %v872_v31  ;;  %v2420_v14 = vand.u32 4294901760, %v69_v5 }
  0x72   :  { %777 = vmatmul.f32.vlgmr.msra.gmra.mxu3 %v2149_v46  ;;  %788 = vmatpush.msrb.mxu0 %v2259_v30  ;;  %v832_v46 = vand.u32 4294901760, %v831_v16  ;;  %v868_v16 = vand.u32 4294901760, %v867_v27 }
  0x73   :  { %928 = vmatpush.msrb.mxu2 %v2262_v59  ;;  %978 = vmatpush.msrb.mxu3 %v2235_v62  ;;  %v855_v49 = vsub.f32 %v2303_v36, %v854_v2  ;;  %v884_v13 = vand.u32 4294901760, %v2379_v24  ;;  %v874_v10 = vand.u32 4294901760, %v873_v22  ;;  %v2444_v21 = vsub.f32 %v69_v5, %v2420_v14 }
  0x74   :  { %667 = vmatpush.msra.mxu1 %v2108_v43  ;;  %790 = vmatpush.msrb.mxu0 %v2269_v57  ;;  %v73_v43 = vld [vmem:[#allocation2 + $0x120] sm:$0xff] }
  0x75   :  { %671 = vmatmul.f32.vlgmr.msra.gmra.mxu1 %v474_v52  ;;  %931 = vmatpush.msrb.mxu2 %v2273_v61  ;;  %v72_v52 = vld [vmem:[#allocation2 + $0x118] sm:$0xff]  ;;  %v2361_v53 = vand.u32 4294901760, %v73_v43  ;;  %v856_v54 = vand.u32 4294901760, %v855_v49  ;;  %v914_v22 = vand.u32 4294901760, %v2444_v21 }
  0x76   :  { %827 = vmatpush.msrb.mxu1 %v826_v18  ;;  %980 = vmatpush.msrb.mxu3 %v2242_v48  ;;  %v2375_v8 = vand.u32 4294901760, %v72_v52 }
  0x77   :  { %792 = vmatpush.msrb.mxu0 %v2277_v15  ;;  %934 = vmatpush.msrb.mxu2 %v2284_v4  ;;  %v2391_v12 = vsub.f32 %v73_v43, %v2361_v53  ;;  %v885_v43 = vsub.f32 %v2379_v24, %v884_v13 }
  0x78   :  { %833 = vmatpush.msrb.mxu1 %v832_v46  ;;  %982 = vmatpush.msrb.mxu3 %v2249_v35  ;;  %v2406_v19 = vsub.f32 %v72_v52, %v2375_v8  ;;  %v815_v46 = vand.u32 4294901760, %v2396_v45  ;;  %v902_v52 = vand.u32 4294901760, %v2416_v20 }
  0x79   :  { %794 = vmatpush.msrb.mxu0 %v2288_v29  ;;  %937 = vmatpush.msrb.mxu2 %v2298_v37  ;;  %v890_v18 = vand.u32 4294901760, %v2391_v12  ;;  %v886_v42 = vand.u32 4294901760, %v885_v43  ;;  %v915_v43 = vsub.f32 %v2444_v21, %v914_v22 }
  0x7a   :  { %839 = vmatpush.msrb.mxu1 %v838_v39  ;;  %984 = vmatpush.msrb.mxu3 %v2259_v30  ;;  %v896_v39 = vand.u32 4294901760, %v2406_v19  ;;  %v903_v27 = vsub.f32 %v2416_v20, %v902_v52 }
  0x7b   :  { %796 = vmatpush.msrb.mxu0 %v2310_v0  ;;  %940 = vmatpush.msrb.mxu2 %v2303_v36  ;;  %v891_v49 = vsub.f32 %v2391_v12, %v890_v18  ;;  %v916_v23 = vand.u32 4294901760, %v915_v43  ;;  %v1296_v36 = vld [vmem:[%s2836_s3 + $0x70] sm:$0xff] }
  0x7c   :  { %845 = vmatpush.msrb.mxu1 %v844_v50  ;;  %986 = vmatpush.msrb.mxu3 %v2269_v57  ;;  %v816_v50 = vsub.f32 %v2396_v45, %v815_v46  ;;  %v904_v9 = vand.u32 4294901760, %v903_v27 }
  0x7d   :  { %798 = vmatpush.msrb.mxu0 %v2323_v25  ;;  %943 = vmatpush.msrb.mxu2 %v2316_v58  ;;  %v892_v26 = vand.u32 4294901760, %v891_v49  ;;  %v1295_v58 = vld [vmem:[%s2836_s3 + $0x68] sm:$0xff] }
  0x7e   :  { %851 = vmatpush.msrb.mxu1 %v850_v38  ;;  %988 = vmatpush.msrb.mxu3 %v2277_v15  ;;  %v897_v38 = vsub.f32 %v2406_v19, %v896_v39 }
  0x7f   :  { %800 = vmatpush.msrb.mxu0 %v2334_v33  ;;  %946 = vmatpush.msrb.mxu2 %v2337_v7 }
  0x80   :  { %857 = vmatpush.msrb.mxu1 %v856_v54  ;;  %990 = vmatpush.msrb.mxu3 %v2288_v29  ;;  %v908_v54 = vand.u32 4294901760, %v2429_v34  ;;  %v898_v5 = vand.u32 4294901760, %v897_v38 }
  0x81   :  { %802 = vmatpush.msrb.mxu0 %v2347_v11  ;;  %949 = vmatpush.msrb.mxu2 %v2350_v44 }
  0x82   :  { %863 = vmatpush.msrb.mxu1 %v862_v6  ;;  %992 = vmatpush.msrb.mxu3 %v2310_v0  ;;  %v817_v6 = vand.u32 4294901760, %v816_v50 }
  0x83   :  { %804 = vmatpush.msrb.mxu0 %v2361_v53  ;;  %952 = vmatpush.msrb.mxu2 %v2365_v55 }
  0x84   :  { %869 = vmatpush.msrb.mxu1 %v868_v16  ;;  %994 = vmatpush.msrb.mxu3 %v2323_v25  ;;  %v909_v16 = vsub.f32 %v2429_v34, %v908_v54 }
  0x85   :  { %806 = vmatpush.msrb.mxu0 %v2375_v8  ;;  %955 = vmatpush.msrb.mxu2 %v2379_v24  ;;  %v1292_v24 = vld [vmem:[%s2836_s3 + $0x50] sm:$0xff] }
  0x86   :  { %875 = vmatpush.msrb.mxu1 %v874_v10  ;;  %996 = vmatpush.msrb.mxu3 %v2334_v33  ;;  %v90_v10 = vld [vmem:[%s2833_s0 + $0x18] sm:$0xff]  ;;  %v910_v49 = vand.u32 4294901760, %v909_v16 }
  0x87   :  { %808 = vmatpush.msrb.mxu0 %v2387_v51  ;;  %958 = vmatpush.msrb.mxu2 %v2391_v12  ;;  %v1666_v12 = vld [vmem:[%s2835_s2] ss:$0 sm:$0xff] }
  0x88   :  { %881 = vmatpush.msrb.mxu1 %v880_v40  ;;  %998 = vmatpush.msrb.mxu3 %v2347_v11  ;;  %v86_v40 = vld [vmem:[#allocation2 + $0x188] sm:$0xff] }
  0x89   :  { %810 = vmatpush.msrb.mxu0 %v2402_v60  ;;  %961 = vmatpush.msrb.mxu2 %v2406_v19  ;;  %v2476_v50 = vand.u32 4294901760, %v86_v40 }
  0x8a   :  { %887 = vmatpush.msrb.mxu1 %v886_v42  ;;  %1000 = vmatpush.msrb.mxu3 %v2361_v53  ;;  %v97_v42 = vsel %vm95_vm0, %v90_v10, 0 }
  0x8b   :  { %812 = vmatpush.msrb.mxu0 %v2420_v14  ;;  %964 = vmatpush.msrb.mxu2 %v2416_v20  ;;  %v1164_v38 = vsub.f32 %v86_v40, %v2476_v50  ;;  %v2487_v27 = vand.u32 4294901760, %v97_v42 }
  0x8c   :  { %893 = vmatpush.msrb.mxu1 %v892_v26  ;;  %1002 = vmatpush.msrb.mxu3 %v2375_v8  ;;  %v85_v26 = vld [vmem:[#allocation2 + $0x180] sm:$0xff] }
  0x8d   :  { %818 = vmatmul.f32.vlgmr.msrb.gmra.mxu0 %v817_v6  ;;  %967 = vmatpush.msrb.mxu2 %v2429_v34  ;;  %v1141_v61 = vsub.f32 %v97_v42, %v2487_v27 }
  0x8e   :  { %1019 = vmatpush.msra.mxu0 %v824_v41  ;;  %899 = vmatpush.msrb.mxu1 %v898_v5  ;;  %v1138_v41 = vand.u32 4294901760, %v85_v26 }
  0x8f   :  { %1004 = vmatpush.msrb.mxu3 %v2387_v51  ;;  %970 = vmatpush.msrb.mxu2 %v2444_v21  ;;  %v1142_v4 = vand.u32 4294901760, %v1141_v61 }
  0x90   :  { %1023 = vmatpush.msra.mxu0 %v830_v32  ;;  %905 = vmatpush.msrb.mxu1 %v904_v9  ;;  %v1170_v59 = vsub.f32 %v85_v26, %v1138_v41  ;;  %v1165_v32 = vand.u32 4294901760, %v1164_v38 }
  0x91   :  { %1006 = vmatpush.msrb.mxu3 %v2402_v60  ;;  %973 = vmatmul.f32.vlgmr.msrb.gmra.mxu2 %v2396_v45 }
  0x92   :  { %1027 = vmatpush.msra.mxu0 %v836_v47  ;;  %911 = vmatpush.msrb.mxu1 %v910_v49  ;;  %v1171_v47 = vand.u32 4294901760, %v1170_v59 }
  0x93   :  { %1008 = vmatpush.msrb.mxu3 %v2420_v14  ;;  %1196 = vmatpush.msra.mxu2 %v1164_v38 }
  0x94   :  { %1012 = vmatmul.f32.vlgmr.msrb.gmra.mxu3 %v815_v46  ;;  %1031 = vmatpush.msra.mxu0 %v842_v17  ;;  %v2555_v17 = vand.u32 4294901760, %v1296_v36 }
  0x95   :  { %917 = vmatpush.msrb.mxu1 %v916_v23  ;;  %1221 = vmatpush.msra.mxu3 %v2476_v50 }
  0x96   :  { %919 = vmatmul.f32.vlgmr.msrb.gmra.mxu1 %v2372_v56  ;;  %1035 = vmatpush.msra.mxu0 %v848_v1  ;;  %v2564_v1 = vsub.f32 %v1296_v36, %v2555_v17 }
  0x97   :  { %1086 = vmatpush.msra.mxu1 %v2235_v62  ;;  %1199 = vmatpush.msra.mxu2 %v1170_v59  ;;  %v1143_v62 = vsub.f32 %v1141_v61, %v1142_v4 }
  0x98   :  { %1039 = vmatpush.msra.mxu0 %v854_v2  ;;  %1223 = vmatpush.msra.mxu3 %v1138_v41  ;;  %v2566_v2 = vand.u32 4294901760, %v1295_v58 }
  0x99   :  { %1088 = vmatpush.msra.mxu1 %v2242_v48  ;;  %1202 = vmatmul.f32.vlgmr.msra.gmra.mxu2 %v1141_v61  ;;  %v1166_v48 = vsub.f32 %v1164_v38, %v1165_v32 }
  0x9a   :  { %1043 = vmatpush.msra.mxu0 %v860_v3  ;;  %1248 = vmatpush.msrb.mxu2 %v1165_v32  ;;  %v1351_v3 = vand.u32 4294901760, %v2564_v1 }
  0x9b   :  { %1090 = vmatpush.msra.mxu1 %v2249_v35  ;;  %1273 = vmatpush.msrb.mxu3 %v2476_v50  ;;  %v1144_v35 = vand.u32 4294901760, %v1143_v62 }
  0x9c   :  { %1047 = vmatpush.msra.mxu0 %v866_v63  ;;  %1227 = vmatmul.f32.vlgmr.msra.gmra.mxu3 %v1142_v4  ;;  %v1352_v55 = vsub.f32 %v2564_v1, %v1351_v3 }
  0x9d   :  { %1092 = vmatpush.msra.mxu1 %v2259_v30  ;;  %1252 = vmatpush.msrb.mxu2 %v1171_v47  ;;  %v1172_v30 = vsub.f32 %v1170_v59, %v1171_v47  ;;  %v1288_v59 = vld [vmem:[%s2836_s3 + $0x30] sm:$0xff] }
  0x9e   :  { %1051 = vmatpush.msra.mxu0 %v872_v31  ;;  %1275 = vmatpush.msrb.mxu3 %v1138_v41  ;;  %v1353_v45 = vand.u32 4294901760, %v1352_v55  ;;  %v2676_v32 = vand.u32 4294901760, %v1288_v59 }
  0x9f   :  { %1094 = vmatpush.msra.mxu1 %v2269_v57  ;;  %v1167_v57 = vand.u32 4294901760, %v1166_v48  ;;  %v1287_v48 = vld [vmem:[%s2836_s3 + $0x28] sm:$0xff] }
  0xa0   :  { %1055 = vmatpush.msra.mxu0 %v878_v28  ;;  %v1290_v28 = vld [vmem:[%s2836_s3 + $0x40] sm:$0xff] }
  0xa1   :  { %1096 = vmatpush.msra.mxu1 %v2277_v15  ;;  %1254 = vmatmul.f32.vlgmr.msrb.gmra.mxu2 %v2487_v27  ;;  %v1173_v15 = vand.u32 4294901760, %v1172_v30  ;;  %v2688_v30 = vsub.f32 %v1288_v59, %v2676_v32  ;;  %v1282_v59 = vld [vmem:[%s2836_s3] sm:$0xff] }
  0xa2   :  { %1059 = vmatpush.msra.mxu0 %v884_v13  ;;  %v2616_v13 = vand.u32 4294901760, %v1292_v24 }
  0xa3   :  { %1098 = vmatpush.msra.mxu1 %v2288_v29  ;;  %v1297_v29 = vld [vmem:[%s2836_s3 + $0x78] sm:$0xff]  ;;  %v1399_v36 = vand.u32 4294901760, %v2688_v30 }
  0xa4   :  { %1063 = vmatpush.msra.mxu0 %v890_v18  ;;  %1277 = vmatmul.f32.vlgmr.msrb.gmra.mxu3 %v2487_v27  ;;  %v2547_v37 = vand.u32 4294901760, %v1297_v29  ;;  %v1289_v18 = vld [vmem:[%s2836_s3 + $0x38] sm:$0xff]  ;;  %v2634_v21 = vsub.f32 %v1292_v24, %v2616_v13 }
  0xa5   :  { %1100 = vmatpush.msra.mxu1 %v2310_v0  ;;  %v2630_v34 = vand.u32 4294901760, %v1289_v18  ;;  %v1400_v24 = vsub.f32 %v2688_v30, %v1399_v36 }
  0xa6   :  { %1067 = vmatpush.msra.mxu0 %v896_v39  ;;  %v2553_v0 = vsub.f32 %v1297_v29, %v2547_v37  ;;  %1303 = vmatpush.msra.mxu2 %v2547_v37  ;;  %v2627_v39 = vand.u32 4294901760, %v1290_v28  ;;  %v1375_v10 = vand.u32 4294901760, %v2634_v21  ;;  %v1286_v29 = vld [vmem:[%s2836_s3 + $0x20] sm:$0xff] }
  0xa7   :  { %1102 = vmatpush.msra.mxu1 %v2323_v25  ;;  %v2648_v16 = vsub.f32 %v1289_v18, %v2630_v34 }
  0xa8   :  { %1071 = vmatpush.msra.mxu0 %v902_v52  ;;  %v1345_v25 = vand.u32 4294901760, %v2553_v0  ;;  %1305 = vmatpush.msra.mxu2 %v2555_v17  ;;  %v2645_v5 = vsub.f32 %v1290_v28, %v2627_v39  ;;  %v1376_v26 = vsub.f32 %v2634_v21, %v1375_v10 }
  0xa9   :  { %1104 = vmatpush.msra.mxu1 %v2334_v33  ;;  %v1294_v33 = vld [vmem:[%s2836_s3 + $0x60] sm:$0xff]  ;;  %v1393_v42 = vand.u32 4294901760, %v2648_v16 }
  0xaa   :  { %1075 = vmatpush.msra.mxu0 %v908_v54  ;;  %v1346_v7 = vsub.f32 %v2553_v0, %v1345_v25  ;;  %1307 = vmatpush.msra.mxu2 %v2566_v2  ;;  %v2583_v44 = vand.u32 4294901760, %v1294_v33  ;;  %v1377_v61 = vand.u32 4294901760, %v1376_v26 }
  0xab   :  { %1106 = vmatpush.msra.mxu1 %v2347_v11  ;;  %v2579_v11 = vsub.f32 %v1295_v58, %v2566_v2  ;;  %v1394_v62 = vsub.f32 %v2648_v16, %v1393_v42 }
  0xac   :  { %1079 = vmatpush.msra.mxu0 %v914_v22  ;;  %v1347_v63 = vand.u32 4294901760, %v1346_v7  ;;  %1309 = vmatpush.msra.mxu2 %v2583_v44 }
  0xad   :  { %1108 = vmatpush.msra.mxu1 %v2361_v53  ;;  %1081 = vmatmul.f32.vlgmr.msra.gmra.mxu0 %v2372_v56  ;;  %v1293_v53 = vld [vmem:[%s2836_s3 + $0x58] sm:$0xff] }
  0xae   :  { %1137 = vmatpush.msrb.mxu0 %v2476_v50  ;;  %v2597_v31 = vand.u32 4294901760, %v1293_v53  ;;  %1348 = vmatpush.msra.mxu3 %v1347_v63  ;;  %v1387_v50 = vand.u32 4294901760, %v2645_v5  ;;  %v1285_v63 = vld [vmem:[%s2836_s3 + $0x18] sm:$0xff] }
  0xaf   :  { %1110 = vmatpush.msra.mxu1 %v2375_v8  ;;  %v2595_v8 = vsub.f32 %v1294_v33, %v2583_v44  ;;  %v2702_v33 = vand.u32 4294901760, %v1286_v29 }
  0xb0   :  { %1139 = vmatpush.msrb.mxu0 %v1138_v41  ;;  %v2625_v46 = vsub.f32 %v1293_v53, %v2597_v31  ;;  %1311 = vmatpush.msra.mxu2 %v2597_v31  ;;  %v1395_v53 = vand.u32 4294901760, %v1394_v62 }
  0xb1   :  { %1112 = vmatpush.msra.mxu1 %v2387_v51  ;;  %v1291_v51 = vld [vmem:[%s2836_s3 + $0x48] sm:$0xff]  ;;  %1354 = vmatpush.msra.mxu3 %v1353_v45  ;;  %v2715_v28 = vsub.f32 %v1286_v29, %v2702_v33  ;;  %v1284_v45 = vld [vmem:[%s2836_s3 + $0x10] sm:$0xff] }
  0xb2   :  { %1446 = vmatpush.msra.mxu0 %v2553_v0  ;;  %v2618_v19 = vand.u32 4294901760, %v1291_v51  ;;  %v1369_v22 = vand.u32 4294901760, %v2625_v46  ;;  %1313 = vmatpush.msra.mxu2 %v2616_v13 }
  0xb3   :  { %1114 = vmatpush.msra.mxu1 %v2402_v60 }
  0xb4   :  { %1449 = vmatpush.msra.mxu0 %v2564_v1  ;;  %v2637_v54 = vsub.f32 %v1291_v51, %v2618_v19  ;;  %v1370_v49 = vsub.f32 %v2625_v46, %v1369_v22  ;;  %1315 = vmatpush.msra.mxu2 %v2618_v19 }
  0xb5   :  { %1116 = vmatpush.msra.mxu1 %v2420_v14  ;;  %1145 = vmatmul.f32.vlgmr.msrb.gmra.mxu0 %v1144_v35  ;;  %v1363_v14 = vand.u32 4294901760, %v2595_v8 }
  0xb6   :  { %1118 = vmatmul.f32.vlgmr.msra.gmra.mxu1 %v2372_v56  ;;  %v1357_v56 = vand.u32 4294901760, %v2579_v11  ;;  %1452 = vmatpush.msra.mxu0 %v2579_v11  ;;  %v1381_v43 = vand.u32 4294901760, %v2637_v54  ;;  %v1371_v41 = vand.u32 4294901760, %v1370_v49 }
  0xb7   :  { %1168 = vmatpush.msrb.mxu1 %v1167_v57  ;;  %v1364_v6 = vsub.f32 %v2595_v8, %v1363_v14  ;;  %1317 = vmatpush.msra.mxu2 %v2627_v39  ;;  %v2690_v57 = vand.u32 4294901760, %v1287_v48 }
  0xb8   :  { %v1358_v60 = vsub.f32 %v2579_v11, %v1357_v56  ;;  %1455 = vmatpush.msra.mxu0 %v2595_v8  ;;  %v1382_v23 = vsub.f32 %v2637_v54, %v1381_v43 }
  0xb9   :  { %1174 = vmatpush.msrb.mxu1 %v1173_v15  ;;  %v1365_v40 = vand.u32 4294901760, %v1364_v6  ;;  %1319 = vmatpush.msra.mxu2 %v2630_v34  ;;  %v2700_v58 = vsub.f32 %v1287_v48, %v2690_v57 }
  0xba   :  { %v1359_v52 = vand.u32 4294901760, %v1358_v60  ;;  %1458 = vmatpush.msra.mxu0 %v2625_v46  ;;  %v1383_v47 = vand.u32 4294901760, %v1382_v23  ;;  %v1401_v60 = vand.u32 4294901760, %v1400_v24 }
  0xbb   :  { %1499 = vmatpush.msra.mxu1 %v2547_v37  ;;  %1321 = vmatpush.msra.mxu2 %v2676_v32  ;;  %v1405_v51 = vand.u32 4294901760, %v2700_v58 }
  0xbc   :  { %1360 = vmatpush.msra.mxu3 %v1359_v52  ;;  %1461 = vmatpush.msra.mxu0 %v2634_v21 }
  0xbd   :  { %1501 = vmatpush.msra.mxu1 %v2555_v17  ;;  %1323 = vmatpush.msra.mxu2 %v2690_v57  ;;  %v1406_v18 = vsub.f32 %v2700_v58, %v1405_v51 }
  0xbe   :  { %1176 = vmatmul.f32.vlgmr.msrb.gmra.mxu1 %v2487_v27  ;;  %1366 = vmatpush.msra.mxu3 %v1365_v40  ;;  %v1388_v27 = vsub.f32 %v2645_v5, %v1387_v50  ;;  %v1283_v40 = vld [vmem:[%s2836_s3 + $0x8] sm:$0xff] }
  0xbf   :  { %1503 = vmatpush.msra.mxu1 %v2566_v2  ;;  %1464 = vmatpush.msra.mxu0 %v2637_v54 }
  0xc0   :  { %1372 = vmatpush.msra.mxu3 %v1371_v41  ;;  %v1389_v15 = vand.u32 4294901760, %v1388_v27  ;;  %1325 = vmatpush.msra.mxu2 %v2702_v33  ;;  %v2749_v27 = vand.u32 4294901760, %v1283_v40 }
  0xc1   :  { %1505 = vmatpush.msra.mxu1 %v2583_v44  ;;  %v137_v20 = vpop.f32.mrf.mxu0  ;;  %1467 = vmatpush.msra.mxu0 %v2645_v5 }
  0xc2   :  { %v138_v9 = vadd.f32 %v1666_v12, %v137_v20  ;;  %1378 = vmatpush.msra.mxu3 %v1377_v61  ;;  %v2717_v12 = vand.u32 4294901760, %v1285_v63  ;;  %v1411_v20 = vand.u32 4294901760, %v2715_v28 }
  0xc3   :  { %1507 = vmatpush.msra.mxu1 %v2597_v31  ;;  %1470 = vmatpush.msra.mxu0 %v2648_v16 }
  0xc4   :  { %1384 = vmatpush.msra.mxu3 %v1383_v47  ;;  %v2730_v52 = vsub.f32 %v1285_v63, %v2717_v12  ;;  %1327 = vmatpush.msra.mxu2 %v2717_v12  ;;  %v1412_v26 = vsub.f32 %v2715_v28, %v1411_v20  ;;  %v2758_v47 = vand.u32 4294901760, %v1282_v59 }
  0xc5   :  { %1509 = vmatpush.msra.mxu1 %v2616_v13  ;;  %1473 = vmatpush.msra.mxu0 %v2688_v30 }
  0xc6   :  { %1390 = vmatpush.msra.mxu3 %v1389_v15  ;;  %v1417_v23 = vand.u32 4294901760, %v2730_v52  ;;  %v1413_v61 = vand.u32 4294901760, %v1412_v26 }
  0xc7   :  { %1511 = vmatpush.msra.mxu1 %v2618_v19  ;;  %1476 = vmatpush.msra.mxu0 %v2700_v58 }
  0xc8   :  { %1396 = vmatpush.msra.mxu3 %v1395_v53 }
  0xc9   :  { %1513 = vmatpush.msra.mxu1 %v2627_v39  ;;  %1479 = vmatpush.msra.mxu0 %v2715_v28 }
  0xca   :  { %1402 = vmatpush.msra.mxu3 %v1401_v60 }
  0xcb   :  { %1515 = vmatpush.msra.mxu1 %v2630_v34  ;;  %1482 = vmatpush.msra.mxu0 %v2730_v52 }
  0xcd   :  { %1517 = vmatpush.msra.mxu1 %v2676_v32 }
  0xce   :  { %v238_v38 = vpop.f32.mrf.mxu1 }
  0xcf   :  { %v239_v4 = vadd.f32 %v238_v38, %v138_v9  ;;  %v292_v35 = vpop.f32.mrf.mxu2  ;;  %v331_v55 = vpop.f32.mrf.mxu3  ;;  %1519 = vmatpush.msra.mxu1 %v2690_v57  ;;  %v2734_v9 = vand.u32 4294901760, %v1284_v45  ;;  %v1407_v38 = vand.u32 4294901760, %v1406_v18 }
  0xd1   :  { %v293_v7 = vadd.f32 %v292_v35, %v239_v4  ;;  %1521 = vmatpush.msra.mxu1 %v2702_v33  ;;  %v2747_v41 = vsub.f32 %v1284_v45, %v2734_v9  ;;  %1329 = vmatpush.msra.mxu2 %v2734_v9  ;;  %v1418_v4 = vsub.f32 %v2730_v52, %v1417_v23 }
  0xd2   :  { %1408 = vmatpush.msra.mxu3 %v1407_v38  ;;  %v2764_v35 = vsub.f32 %v1283_v40, %v2749_v27 }
  0xd3   :  { %v332_v6 = vadd.f32 %v331_v55, %v293_v7  ;;  %1523 = vmatpush.msra.mxu1 %v2717_v12  ;;  %v1423_v48 = vand.u32 4294901760, %v2747_v41  ;;  %1331 = vmatpush.msra.mxu2 %v2749_v27  ;;  %v1419_v29 = vand.u32 4294901760, %v1418_v4  ;;  %v2768_v7 = vsub.f32 %v1282_v59, %v2758_v47 }
  0xd4   :  { %v400_v49 = vpop.f32.mrf.mxu0  ;;  %1485 = vmatpush.msra.mxu0 %v2747_v41  ;;  %1414 = vmatpush.msra.mxu3 %v1413_v61  ;;  %v1429_v63 = vand.u32 4294901760, %v2764_v35 }
  0xd5   :  { %1525 = vmatpush.msra.mxu1 %v2734_v9  ;;  %v401_v62 = vadd.f32 %v400_v49, %v332_v6  ;;  %v1424_v53 = vsub.f32 %v2747_v41, %v1423_v48  ;;  %1333 = vmatpush.msra.mxu2 %v2758_v47  ;;  %v1435_v55 = vand.u32 4294901760, %v2768_v7 }
  0xd6   :  { %1488 = vmatpush.msra.mxu0 %v2764_v35  ;;  %1420 = vmatpush.msra.mxu3 %v1419_v29  ;;  %v1430_v60 = vsub.f32 %v2764_v35, %v1429_v63 }
  0xd7   :  { %v437_v15 = vpop.f32.mrf.mxu1  ;;  %1527 = vmatpush.msra.mxu1 %v2749_v27  ;;  %1540 = vmatpush.msrb.mxu2 %v1345_v25  ;;  %v1425_v45 = vand.u32 4294901760, %v1424_v53  ;;  %v1436_v6 = vsub.f32 %v2768_v7, %v1435_v55 }
  0xd8   :  { %v438_v24 = vadd.f32 %v437_v15, %v401_v62  ;;  %v478_v18 = vpop.f32.mrf.mxu2  ;;  %1491 = vmatpush.msra.mxu0 %v2768_v7  ;;  %v1431_v0 = vand.u32 4294901760, %v1430_v60 }
  0xd9   :  { %1529 = vmatpush.msra.mxu1 %v2758_v47  ;;  %1544 = vmatpush.msrb.mxu2 %v1351_v3  ;;  %v1437_v25 = vand.u32 4294901760, %v1436_v6 }
  0xda   :  { %1426 = vmatpush.msra.mxu3 %v1425_v45  ;;  %v479_v40 = vadd.f32 %v478_v18, %v438_v24 }
  0xdb   :  { %1548 = vmatpush.msrb.mxu2 %v1357_v56  ;;  %v579_v49 = vpop.f32.mrf.mxu3 }
  0xdc   :  { %1432 = vmatpush.msra.mxu3 %v1431_v0  ;;  %v580_v1 = vadd.f32 %v579_v49, %v479_v40 }
  0xdd   :  { %1552 = vmatpush.msrb.mxu2 %v1363_v14 }
  0xde   :  { %1438 = vmatpush.msra.mxu3 %v1437_v25 }
  0xdf   :  { %1556 = vmatpush.msrb.mxu2 %v1369_v22 }
  0xe0   :  { %1607 = vmatpush.msrb.mxu3 %v2547_v37 }
  0xe1   :  { %1560 = vmatpush.msrb.mxu2 %v1375_v10 }
  0xe2   :  { %1609 = vmatpush.msrb.mxu3 %v2555_v17 }
  0xe3   :  { %1564 = vmatpush.msrb.mxu2 %v1381_v43 }
  0xe4   :  { %1611 = vmatpush.msrb.mxu3 %v2566_v2 }
  0xe5   :  { %1568 = vmatpush.msrb.mxu2 %v1387_v50 }
  0xe6   :  { %1613 = vmatpush.msrb.mxu3 %v2583_v44 }
  0xe7   :  { %1572 = vmatpush.msrb.mxu2 %v1393_v42 }
  0xe8   :  { %v633_v38 = vpop.f32.mrf.mxu0  ;;  %1615 = vmatpush.msrb.mxu3 %v2597_v31 }
  0xe9   :  { %v634_v11 = vadd.f32 %v633_v38, %v580_v1  ;;  %1576 = vmatpush.msrb.mxu2 %v1399_v36 }
  0xea   :  { %1617 = vmatpush.msrb.mxu3 %v2616_v13 }
  0xeb   :  { %1580 = vmatpush.msrb.mxu2 %v1405_v51 }
  0xec   :  { %1619 = vmatpush.msrb.mxu3 %v2618_v19 }
  0xed   :  { %1584 = vmatpush.msrb.mxu2 %v1411_v20 }
  0xee   :  { %1621 = vmatpush.msrb.mxu3 %v2627_v39 }
  0xef   :  { %1588 = vmatpush.msrb.mxu2 %v1417_v23  ;;  %v1667_v23 = vld [vmem:[%s2837_s4] ss:$0 sm:$0xff] }
  0xf0   :  { %1623 = vmatpush.msrb.mxu3 %v2630_v34 }
  0xf1   :  { %1592 = vmatpush.msrb.mxu2 %v1423_v48 }
  0xf2   :  { %v672_v3 = vpop.f32.mrf.mxu1  ;;  %v741_v8 = vpop.f32.mrf.mxu2  ;;  %1625 = vmatpush.msrb.mxu3 %v2676_v32 }
  0xf3   :  { %v673_v56 = vadd.f32 %v672_v3, %v634_v11  ;;  %1596 = vmatpush.msrb.mxu2 %v1429_v63 }
  0xf4   :  { %1627 = vmatpush.msrb.mxu3 %v2690_v57 }
  0xf5   :  { %v742_v37 = vadd.f32 %v741_v8, %v673_v56  ;;  %v778_v17 = vpop.f32.mrf.mxu3  ;;  %1600 = vmatpush.msrb.mxu2 %v1435_v55 }
  0xf6   :  { %1629 = vmatpush.msrb.mxu3 %v2702_v33 }
  0xf7   :  { %v779_v44 = vadd.f32 %v778_v17, %v742_v37 }
  0xf8   :  { %1631 = vmatpush.msrb.mxu3 %v2717_v12 }
  0xfa   :  { %1633 = vmatpush.msrb.mxu3 %v2734_v9 }
  0xfc   :  { %1635 = vmatpush.msrb.mxu3 %v2749_v27 }
  0xfe   :  { %1637 = vmatpush.msrb.mxu3 %v2758_v47 }
 0x10a   :  { %v819_v2 = vpop.f32.mrf.mxu0 }
 0x10b   :  { %v820_v31 = vadd.f32 %v819_v2, %v779_v44 }
 0x113   :  { %v920_v14 = vpop.f32.mrf.mxu1 }
 0x114   :  { %v921_v13 = vadd.f32 %v920_v14, %v820_v31  ;;  %v974_v46 = vpop.f32.mrf.mxu2 }
 0x116   :  { %v975_v19 = vadd.f32 %v974_v46, %v921_v13 }
 0x117   :  { %v1013_v39 = vpop.f32.mrf.mxu3 }
 0x118   :  { %v1014_v34 = vadd.f32 %v1013_v39, %v975_v19 }
 0x11c   :  { %v1203_v5 = vpop.f32.mrf.mxu2 }
 0x11f   :  { %v1228_v43 = vpop.f32.mrf.mxu3 }
 0x124   :  { %v1255_v57 = vpop.f32.mrf.mxu2 }
 0x127   :  { %v1278_v58 = vpop.f32.mrf.mxu3 }
 0x12a   :  { %v1082_v21 = vpop.f32.mrf.mxu0 }
 0x12b   :  { %v1083_v22 = vadd.f32 %v1082_v21, %v1014_v34 }
 0x132   :  { %v1146_v10 = vpop.f32.mrf.mxu0 }
 0x133   :  { %v1119_v54 = vpop.f32.mrf.mxu1 }
 0x134   :  { %v1120_v16 = vadd.f32 %v1119_v54, %v1083_v22 }
 0x136   :  { %v1147_v50 = vadd.f32 %v1146_v10, %v1120_v16 }
 0x13b   :  { %v1177_v42 = vpop.f32.mrf.mxu1 }
 0x13c   :  { %v1178_v32 = vadd.f32 %v1177_v42, %v1147_v50 }
 0x13e   :  { %v1204_v30 = vadd.f32 %v1203_v5, %v1178_v32 }
 0x140   :  { %v1229_v36 = vadd.f32 %v1228_v43, %v1204_v30 }
 0x142   :  { %v1256_v33 = vadd.f32 %v1255_v57, %v1229_v36 }
 0x144   :  { %v1279_v51 = vadd.f32 %v1278_v58, %v1256_v33 }
 0x146   :  { %1668 = vtanh.f32 %v1279_v51 }
 0x14c   :  { %v1669_v28 = vpop.eup %1668 }
 0x14d   :  { %v1334_v12 = vand.u32 4294901760, %v1669_v28 }
 0x14f   :  { %1440 = vmatmul.f32.vlgmr.msra.gmra.mxu3 %v1334_v12  ;;  %v1335_v20 = vsub.f32 %v1669_v28, %v1334_v12 }
 0x151   :  { %1494 = vmatmul.f32.vlgmr.msra.gmra.mxu0 %v1335_v20  ;;  %v1336_v52 = vand.u32 4294901760, %v1335_v20 }
 0x153   :  { %1533 = vmatmul.f32.vlgmr.msra.gmra.mxu1 %v1336_v52  ;;  %v1337_v9 = vsub.f32 %v1335_v20, %v1336_v52 }
 0x155   :  { %v1338_v26 = vand.u32 4294901760, %v1337_v9 }
 0x157   :  { %1339 = vmatmul.f32.vlgmr.msra.gmra.mxu2 %v1338_v26  ;;  %1639 = vmatmul.f32.vlgmr.msrb.gmra.mxu3 %v1334_v12 }
 0x15f   :  { %1602 = vmatmul.f32.vlgmr.msrb.gmra.mxu2 %v1334_v12 }
 0x1ce   :  { %v1495_v4 = vpop.f32.mrf.mxu0 }
 0x1d0   :  { %v1534_v62 = vpop.f32.mrf.mxu1 }
 0x1d2   :  { %v1441_v41 = vpop.f32.mrf.mxu3 }
 0x1da   :  { %v1340_v27 = vpop.f32.mrf.mxu2  ;;  %v1640_v29 = vpop.f32.mrf.mxu3 }
 0x1db   :  { %v1341_v59 = vadd.f32 %v1667_v23, %v1340_v27 }
 0x1dd   :  { %v1442_v61 = vadd.f32 %v1441_v41, %v1341_v59 }
 0x1df   :  { %v1496_v47 = vadd.f32 %v1495_v4, %v1442_v61 }
 0x1e1   :  { %v1535_v48 = vadd.f32 %v1534_v62, %v1496_v47 }
 0x1e2   :  { %v1603_v35 = vpop.f32.mrf.mxu2 }
 0x1e3   :  { %v1604_v15 = vadd.f32 %v1603_v35, %v1535_v48 }
 0x1e5   :  { %v1641_v7 = vadd.f32 %v1640_v29, %v1604_v15 }
 0x1e7   :  { %1644 = vst.msk [vmem:[#allocation5] sm:$0xff] %vm1643_vm1, %v1641_v7 }
 0x1e8   :  { %1655 = dma.vmem_to_hbm [thread:$0]  %s1651_s14, 128, %s1653_s17, [#allocation4]  }
 0x1e9   :  { %1720 = dma.done.wait [#allocation4], 128  }
 0x1ea   :  { %1721 = vsyncadd [#allocation4], 4294967168 }
 0x1eb   :  { %1660 = vsyncpa [#allocation3], 1 }
 0x1ec   :  { %1661 = vsyncpa [#allocation4], 1 }

</bundles_post_ra>
